<compile_context>
chip_gen: v6e
topology: v6e:2x2x1
jax: 0.10.0
libtpu: 0.0.40
codegen_flags: <defaults>
</compile_context>

<pallas_src>
import functools

import jax
import jax.numpy as jnp
from jax.experimental import pallas as pl
from jax.experimental.pallas import tpu as pltpu

LANE = 128  # lane-dense width for the padded final layer output


def mlp_kernel(x_ref, w1_ref, b1_ref, w2_ref, b2_ref, w3_ref, b3_ref,
               w4_ref, b4_ref, o_ref):
    """Full 4-layer MLP forward on one (TB, 9) batch tile. All matmuls hit the MXU
    with f32 accumulation; ReLU runs on the VPU. Weights are VMEM-resident."""
    x = x_ref[...]

    h = jnp.dot(x, w1_ref[...], preferred_element_type=jnp.float32) + b1_ref[...]
    h = jnp.maximum(h, 0.0)

    h = jnp.dot(h, w2_ref[...], preferred_element_type=jnp.float32) + b2_ref[...]
    h = jnp.maximum(h, 0.0)

    h = jnp.dot(h, w3_ref[...], preferred_element_type=jnp.float32) + b3_ref[...]
    h = jnp.maximum(h, 0.0)

    out = jnp.dot(h, w4_ref[...], preferred_element_type=jnp.float32) + b4_ref[...]
    o_ref[...] = out.astype(o_ref.dtype)  # (TB, 128) lane-dense store


def _round_up(n, m):
    return pl.cdiv(n, m) * m


def neural_network_forward(x, params, *, tile_batch=4096):
    """x: (B, 9) float32 -> (B, 9) float32. params: dict of w1,b1,...,w4,b4."""
    B, f_in = x.shape
    assert f_in == 9

    w1, b1 = params["w1"], params["b1"]
    w2, b2 = params["w2"], params["b2"]
    w3, b3 = params["w3"], params["b3"]
    w4, b4 = params["w4"], params["b4"]

    # Lane-dense final layer: pad W4 (64,9)->(64,128), b4 (1,9)->(1,128) with zeros.
    w4p = jnp.pad(w4, ((0, 0), (0, LANE - w4.shape[1])))
    b4p = jnp.pad(b4, ((0, 0), (0, LANE - b4.shape[1])))

    # Tile selection:
    #  - large B: MXU-aligned tile (multiple of 256), 1-D batch grid.
    #  - small B: one block (rounded up to the 8-row sublane granule).
    if B >= tile_batch:
        tb = tile_batch
    else:
        tb = max(8, _round_up(B, 8))
    b_pad = _round_up(B, tb)
    if b_pad != B:
        x = jnp.pad(x, ((0, b_pad - B), (0, 0)))  # zero rows; discarded on slice

    grid = (b_pad // tb,)

    # Weights/biases: full-array blocks with a constant index_map -> fetched once,
    # VMEM-resident across all grid iterations.
    resident = lambda arr: pl.BlockSpec(arr.shape, lambda i: (0, 0))

    out = pl.pallas_call(
        mlp_kernel,
        out_shape=jax.ShapeDtypeStruct((b_pad, LANE), jnp.float32),
        grid=grid,
        in_specs=[
            pl.BlockSpec((tb, f_in), lambda i: (i, 0)),   # streamed batch tiles of x
            resident(w1), resident(b1),
            resident(w2), resident(b2),
            resident(w3), resident(b3),
            resident(w4p), resident(b4p),
        ],
        out_specs=pl.BlockSpec((tb, LANE), lambda i: (i, 0)),
        compiler_params=pltpu.CompilerParams(
            dimension_semantics=("parallel",)),  # megacore split on v7x; no-op on v5e/v6e
    )(x, w1, b1, w2, b2, w3, b3, w4p, b4p)

    return out[:B, :9]


def init_params(key):
    """Deterministic init matching PyTorch Linear shapes.
    Weights stored transposed vs torch, i.e. (in, out), for direct x @ W."""
    dims = [(9, 64), (64, 64), (64, 64), (64, 9)]
    params = {}
    for i, (fan_in, fan_out) in enumerate(dims, start=1):
        key, kw, kb = jax.random.split(key, 3)
        bound = 1.0 / jnp.sqrt(fan_in)
        params[f"w{i}"] = jax.random.uniform(
            kw, (fan_in, fan_out), jnp.float32, minval=-bound, maxval=bound)
        # Keep biases 2D (1, out) for clean TPU layout / broadcasting.
        params[f"b{i}"] = jax.random.uniform(
            kb, (1, fan_out), jnp.float32, minval=-bound, maxval=bound)
    return params


def reference_forward(x, p):
    h = jnp.maximum(x @ p["w1"] + p["b1"], 0.0)
    h = jnp.maximum(h @ p["w2"] + p["b2"], 0.0)
    h = jnp.maximum(h @ p["w3"] + p["b3"], 0.0)
    return h @ p["w4"] + p["b4"]


if __name__ == "__main__":
    key = jax.random.PRNGKey(0)
    key, kx = jax.random.split(key)
    params = init_params(key)

    # 1) Small-batch path (single block, matches the PyTorch module at B=8).
    B = 8
    x = jax.random.normal(kx, (B, 9), jnp.float32)
    out = jax.block_until_ready(neural_network_forward(x, params))
    ref = reference_forward(x, params)
    assert out.shape == (B, 9)
    assert jnp.allclose(out, ref, atol=1e-5, rtol=1e-5)

    # 2) Gridded path sanity check (ragged batch -> multiple pipelined tiles + padding).
    key, kx2 = jax.random.split(key)
    B2 = 1037
    x2 = jax.random.normal(kx2, (B2, 9), jnp.float32)
    out2 = jax.block_until_ready(
        neural_network_forward(x2, params, tile_batch=512))
    ref2 = reference_forward(x2, params)
    assert out2.shape == (B2, 9)
    assert jnp.allclose(out2, ref2, atol=1e-5, rtol=1e-5)

    print("KERNEL_OK")
</pallas_src>

<mosaic_0001>
module attributes {stable_mosaic.version = 11 : i64} {
  func.func @mlp_kernel(%arg0: i32, %arg1: memref<8x9xf32, #tpu.memory_space<vmem>>, %arg2: memref<9x64xf32, #tpu.memory_space<vmem>>, %arg3: memref<1x64xf32, #tpu.memory_space<vmem>>, %arg4: memref<64x64xf32, #tpu.memory_space<vmem>>, %arg5: memref<1x64xf32, #tpu.memory_space<vmem>>, %arg6: memref<64x64xf32, #tpu.memory_space<vmem>>, %arg7: memref<1x64xf32, #tpu.memory_space<vmem>>, %arg8: memref<64x128xf32, #tpu.memory_space<vmem>>, %arg9: memref<1x128xf32, #tpu.memory_space<vmem>>, %arg10: memref<8x128xf32, #tpu.memory_space<vmem>>) attributes {dimension_semantics = [#tpu.dimension_semantics<parallel>], iteration_bounds = array<i64: 1>, scalar_prefetch = 0 : i64, scratch_operands = 0 : i64, tpu.core_type = #tpu.core_type<tc>, window_params = [{transform_indices = @transform_0, window_bounds = array<i64: 8, 9>}, {pipeline_mode = #tpu.pipeline_mode<synchronous>, transform_indices = @transform_1, window_bounds = array<i64: 9, 64>}, {pipeline_mode = #tpu.pipeline_mode<synchronous>, transform_indices = @transform_2, window_bounds = array<i64: 1, 64>}, {pipeline_mode = #tpu.pipeline_mode<synchronous>, transform_indices = @transform_3, window_bounds = array<i64: 64, 64>}, {pipeline_mode = #tpu.pipeline_mode<synchronous>, transform_indices = @transform_4, window_bounds = array<i64: 1, 64>}, {pipeline_mode = #tpu.pipeline_mode<synchronous>, transform_indices = @transform_5, window_bounds = array<i64: 64, 64>}, {pipeline_mode = #tpu.pipeline_mode<synchronous>, transform_indices = @transform_6, window_bounds = array<i64: 1, 64>}, {pipeline_mode = #tpu.pipeline_mode<synchronous>, transform_indices = @transform_7, window_bounds = array<i64: 64, 128>}, {pipeline_mode = #tpu.pipeline_mode<synchronous>, transform_indices = @transform_8, window_bounds = array<i64: 1, 128>}, {transform_indices = @transform_9, window_bounds = array<i64: 8, 128>}]} {
    %c0 = arith.constant 0 : index
    %c0_0 = arith.constant 0 : index
    %0 = vector.load %arg1[%c0, %c0_0] : memref<8x9xf32, #tpu.memory_space<vmem>>, vector<8x9xf32>
    %c0_1 = arith.constant 0 : index
    %c0_2 = arith.constant 0 : index
    %1 = vector.load %arg2[%c0_1, %c0_2] : memref<9x64xf32, #tpu.memory_space<vmem>>, vector<9x64xf32>
    %cst = arith.constant dense<0.000000e+00> : vector<8x64xf32>
    %2 = tpu.matmul %0, %1, %cst {dimension_numbers = #tpu.dot_dimension_numbers<[1], [0], [0], [1], [0, 0, 1, 1], [], []>} : vector<8x9xf32>, vector<9x64xf32>, vector<8x64xf32> -> vector<8x64xf32>
    %c0_3 = arith.constant 0 : index
    %c0_4 = arith.constant 0 : index
    %3 = vector.load %arg3[%c0_3, %c0_4] : memref<1x64xf32, #tpu.memory_space<vmem>>, vector<1x64xf32>
    %4 = vector.broadcast %3 : vector<1x64xf32> to vector<8x64xf32>
    %5 = arith.addf %2, %4 : vector<8x64xf32>
    %cst_5 = arith.constant 0.000000e+00 : f32
    %6 = vector.broadcast %cst_5 : f32 to vector<8x64xf32>
    %7 = arith.maximumf %5, %6 : vector<8x64xf32>
    %c0_6 = arith.constant 0 : index
    %c0_7 = arith.constant 0 : index
    %8 = vector.load %arg4[%c0_6, %c0_7] : memref<64x64xf32, #tpu.memory_space<vmem>>, vector<64x64xf32>
    %cst_8 = arith.constant dense<0.000000e+00> : vector<8x64xf32>
    %9 = tpu.matmul %7, %8, %cst_8 {dimension_numbers = #tpu.dot_dimension_numbers<[1], [0], [0], [1], [0, 0, 1, 1], [], []>} : vector<8x64xf32>, vector<64x64xf32>, vector<8x64xf32> -> vector<8x64xf32>
    %c0_9 = arith.constant 0 : index
    %c0_10 = arith.constant 0 : index
    %10 = vector.load %arg5[%c0_9, %c0_10] : memref<1x64xf32, #tpu.memory_space<vmem>>, vector<1x64xf32>
    %11 = vector.broadcast %10 : vector<1x64xf32> to vector<8x64xf32>
    %12 = arith.addf %9, %11 : vector<8x64xf32>
    %cst_11 = arith.constant 0.000000e+00 : f32
    %13 = vector.broadcast %cst_11 : f32 to vector<8x64xf32>
    %14 = arith.maximumf %12, %13 : vector<8x64xf32>
    %c0_12 = arith.constant 0 : index
    %c0_13 = arith.constant 0 : index
    %15 = vector.load %arg6[%c0_12, %c0_13] : memref<64x64xf32, #tpu.memory_space<vmem>>, vector<64x64xf32>
    %cst_14 = arith.constant dense<0.000000e+00> : vector<8x64xf32>
    %16 = tpu.matmul %14, %15, %cst_14 {dimension_numbers = #tpu.dot_dimension_numbers<[1], [0], [0], [1], [0, 0, 1, 1], [], []>} : vector<8x64xf32>, vector<64x64xf32>, vector<8x64xf32> -> vector<8x64xf32>
    %c0_15 = arith.constant 0 : index
    %c0_16 = arith.constant 0 : index
    %17 = vector.load %arg7[%c0_15, %c0_16] : memref<1x64xf32, #tpu.memory_space<vmem>>, vector<1x64xf32>
    %18 = vector.broadcast %17 : vector<1x64xf32> to vector<8x64xf32>
    %19 = arith.addf %16, %18 : vector<8x64xf32>
    %cst_17 = arith.constant 0.000000e+00 : f32
    %20 = vector.broadcast %cst_17 : f32 to vector<8x64xf32>
    %21 = arith.maximumf %19, %20 : vector<8x64xf32>
    %c0_18 = arith.constant 0 : index
    %c0_19 = arith.constant 0 : index
    %22 = vector.load %arg8[%c0_18, %c0_19] : memref<64x128xf32, #tpu.memory_space<vmem>>, vector<64x128xf32>
    %cst_20 = arith.constant dense<0.000000e+00> : vector<8x128xf32>
    %23 = tpu.matmul %21, %22, %cst_20 {dimension_numbers = #tpu.dot_dimension_numbers<[1], [0], [0], [1], [0, 0, 1, 1], [], []>} : vector<8x64xf32>, vector<64x128xf32>, vector<8x128xf32> -> vector<8x128xf32>
    %c0_21 = arith.constant 0 : index
    %c0_22 = arith.constant 0 : index
    %24 = vector.load %arg9[%c0_21, %c0_22] : memref<1x128xf32, #tpu.memory_space<vmem>>, vector<1x128xf32>
    %25 = vector.broadcast %24 : vector<1x128xf32> to vector<8x128xf32>
    %26 = arith.addf %23, %25 : vector<8x128xf32>
    %c0_23 = arith.constant 0 : index
    %c0_24 = arith.constant 0 : index
    %27 = vector.load %arg10[%c0_23, %c0_24] : memref<8x128xf32, #tpu.memory_space<vmem>>, vector<8x128xf32>
    tpu.vector_store %arg10[%c0_23, %c0_24], %26 {strides = array<i32>} : memref<8x128xf32, #tpu.memory_space<vmem>>, vector<8x128xf32>,
    return
  }
  func.func @transform_0(%arg0: i32) -> (i32, i32) {
    %c0_i32 = arith.constant 0 : i32
    %c0_i32_0 = arith.constant 0 : i32
    return %arg0, %c0_i32 : i32, i32
  }
  func.func @transform_1(%arg0: i32) -> (i32, i32) {
    %c0_i32 = arith.constant 0 : i32
    %c0_i32_0 = arith.constant 0 : i32
    %c0_i32_1 = arith.constant 0 : i32
    return %c0_i32, %c0_i32_0 : i32, i32
  }
  func.func @transform_2(%arg0: i32) -> (i32, i32) {
    %c0_i32 = arith.constant 0 : i32
    %c0_i32_0 = arith.constant 0 : i32
    %c0_i32_1 = arith.constant 0 : i32
    return %c0_i32, %c0_i32_0 : i32, i32
  }
  func.func @transform_3(%arg0: i32) -> (i32, i32) {
    %c0_i32 = arith.constant 0 : i32
    %c0_i32_0 = arith.constant 0 : i32
    %c0_i32_1 = arith.constant 0 : i32
    return %c0_i32, %c0_i32_0 : i32, i32
  }
  func.func @transform_4(%arg0: i32) -> (i32, i32) {
    %c0_i32 = arith.constant 0 : i32
    %c0_i32_0 = arith.constant 0 : i32
    %c0_i32_1 = arith.constant 0 : i32
    return %c0_i32, %c0_i32_0 : i32, i32
  }
  func.func @transform_5(%arg0: i32) -> (i32, i32) {
    %c0_i32 = arith.constant 0 : i32
    %c0_i32_0 = arith.constant 0 : i32
    %c0_i32_1 = arith.constant 0 : i32
    return %c0_i32, %c0_i32_0 : i32, i32
  }
  func.func @transform_6(%arg0: i32) -> (i32, i32) {
    %c0_i32 = arith.constant 0 : i32
    %c0_i32_0 = arith.constant 0 : i32
    %c0_i32_1 = arith.constant 0 : i32
    return %c0_i32, %c0_i32_0 : i32, i32
  }
  func.func @transform_7(%arg0: i32) -> (i32, i32) {
    %c0_i32 = arith.constant 0 : i32
    %c0_i32_0 = arith.constant 0 : i32
    %c0_i32_1 = arith.constant 0 : i32
    return %c0_i32, %c0_i32_0 : i32, i32
  }
  func.func @transform_8(%arg0: i32) -> (i32, i32) {
    %c0_i32 = arith.constant 0 : i32
    %c0_i32_0 = arith.constant 0 : i32
    %c0_i32_1 = arith.constant 0 : i32
    return %c0_i32, %c0_i32_0 : i32, i32
  }
  func.func @transform_9(%arg0: i32) -> (i32, i32) {
    %c0_i32 = arith.constant 0 : i32
    %c0_i32_0 = arith.constant 0 : i32
    return %arg0, %c0_i32 : i32, i32
  }
}

</mosaic_0001>

<bundles_post_ra>
// kernel: tpu_custom_call.1
= control target key start
LH: loop header
LB: loop body
LE: loop exit
PB: predicated region body
PF: predicated region fallthrough
CT: control target
= control target key end

     0   :  { %14 = vsyncpa [#allocation3], 0  ;;  %s853_s0 = inlined_call_operand.hbm [shape: f32[8,9], index: 0, kind: input, shape index: {}]   ;;  %s854_s1 = inlined_call_operand.hbm [shape: f32[9,64], index: 1, kind: input, shape index: {}]   ;;  %s855_s2 = inlined_call_operand.vmem [shape: f32[1,64], index: 2, kind: input, shape index: {}]   ;;  %s856_s3 = inlined_call_operand.hbm [shape: f32[64,64], index: 3, kind: input, shape index: {}]   ;;  %s857_s4 = inlined_call_operand.vmem [shape: f32[1,64], index: 4, kind: input, shape index: {}]   ;;  %s858_s5 = inlined_call_operand.hbm [shape: f32[64,64], index: 5, kind: input, shape index: {}]   ;;  %s859_s6 = inlined_call_operand.vmem [shape: f32[1,64], index: 6, kind: input, shape index: {}]   ;;  %s860_s7 = inlined_call_operand.hbm [shape: f32[64,128], index: 7, kind: input, shape index: {}]   ;;  %s861_s8 = inlined_call_operand.vmem [shape: f32[1,128], index: 8, kind: input, shape index: {}]   ;;  %s862_s9 = inlined_call_operand.hbm [shape: f32[8,128], index: 9, kind: output, shape index: {}]  }
   0x1   :  { %15 = vsyncpa [#allocation6], 0 }
   0x2   :  { %16 = vsyncpa [#allocation9], 0 }
   0x3   :  { %17 = vsyncpa [#allocation4], 0  ;;  %s714_s30 = smov [#allocation5]  }
   0x4   :  { %s33_s10 = sshll.u32 %s714_s30, 4  ;;  %s34_s10 = int_to_ptr.vmem [resolvable:$true] %s33_s10 }
   0x5   :  { %s594_s11 = scalar_lea.vmem %s34_s10, 256  ;;  %p599_p1 = scmp.lt.s32.totalorder %s34_s10, %s34_s10 }
   0x6   :  { %p595_p0 = scmp.ne.s32.totalorder %s34_s10, %s594_s11  ;;  %p600_p2 = scmp.lt.s32.totalorder %s594_s11, %s594_s11 }
   0x8   :  { %p601_p3 = por %p600_p2, %p599_p1 }
   0xa   :  { %p602_p4 = pnand %p601_p3, %p595_p0 }
   0xc   :  { %605 = shalt.err (!%p602_p4)
}
   0xd   :  { %s715_s12 = smov 128   ;;  %s716_s13 = smov 8  }
   0xe   :  { %39 = dma.hbm_to_vmem [thread:$0]  %s854_s1, 256, %s34_s10, [#allocation6], %s715_s12, %s715_s12, %s716_s13  }
   0xf   :  { %s717_s16 = smov [#allocation8]   ;;  %s718_s18 = smov [#allocation2]  }
  0x10   :  { %s61_s17 = sshll.u32 %s717_s16, 4  ;;  %s24_s19 = sshll.u32 %s718_s18, 4  ;;  %s62_s17 = int_to_ptr.vmem [resolvable:$true] %s61_s17  ;;  %s25_s19 = int_to_ptr.vmem [resolvable:$true] %s24_s19 }
  0x11   :  { %s614_s20 = scalar_lea.vmem %s62_s17, 1024  ;;  %p619_p6 = scmp.lt.s32.totalorder %s62_s17, %s62_s17 }
  0x12   :  { %p615_p5 = scmp.ne.s32.totalorder %s62_s17, %s614_s20  ;;  %p620_p7 = scmp.lt.s32.totalorder %s614_s20, %s614_s20 }
  0x14   :  { %p621_p8 = por %p620_p7, %p619_p6 }
  0x16   :  { %p622_p9 = pnand %p621_p8, %p615_p5 }
  0x18   :  { %625 = shalt.err (!%p622_p9)
}
  0x19   :  { %67 = dma.hbm_to_vmem [thread:$0]  %s858_s5, 1024, %s62_s17, [#allocation9], %s715_s12, %s715_s12, %s716_s13  }
  0x1a   :  { %s634_s1 = scalar_lea.vmem %s25_s19, 128  ;;  %p639_p11 = scmp.lt.s32.totalorder %s25_s19, %s25_s19 }
  0x1b   :  { %p635_p10 = scmp.ne.s32.totalorder %s25_s19, %s634_s1  ;;  %p640_p12 = scmp.lt.s32.totalorder %s634_s1, %s634_s1 }
  0x1d   :  { %p641_p13 = por %p640_p12, %p639_p11 }
  0x1f   :  { %p642_p0 = pnand %p641_p13, %p635_p10 }
  0x21   :  { %645 = shalt.err (!%p642_p0)
}
  0x22   :  { %27 = dma.hbm_to_vmem [thread:$0]  %s853_s0, 128, %s25_s19, [#allocation3]  }
  0x23   :  { %s719_s25 = smov [#allocation7]   ;;  %s720_s27 = smov [#allocation10]  }
  0x24   :  { %s47_s26 = sshll.u32 %s719_s25, 4  ;;  %s75_s28 = sshll.u32 %s720_s27, 4  ;;  %s48_s26 = int_to_ptr.vmem [resolvable:$true] %s47_s26  ;;  %s76_s28 = int_to_ptr.vmem [resolvable:$true] %s75_s28 }
  0x25   :  { %s654_s29 = scalar_lea.vmem %s48_s26, 1024  ;;  %p659_p2 = scmp.lt.s32.totalorder %s48_s26, %s48_s26 }
  0x26   :  { %p655_p1 = scmp.ne.s32.totalorder %s48_s26, %s654_s29  ;;  %p660_p3 = scmp.lt.s32.totalorder %s654_s29, %s654_s29 }
  0x28   :  { %p661_p4 = por %p660_p3, %p659_p2 }
  0x2a   :  { %p662_p5 = pnand %p661_p4, %p655_p1 }
  0x2c   :  { %665 = shalt.err (!%p662_p5)
}
  0x2d   :  { %53 = dma.hbm_to_vmem [thread:$0]  %s856_s3, 1024, %s48_s26, [#allocation6], %s715_s12, %s715_s12, %s716_s13  }
  0x2e   :  { %s674_s0 = scalar_lea.vmem %s76_s28, 1024  ;;  %p679_p7 = scmp.lt.s32.totalorder %s76_s28, %s76_s28 }
  0x2f   :  { %p675_p6 = scmp.ne.s32.totalorder %s76_s28, %s674_s0  ;;  %p680_p8 = scmp.lt.s32.totalorder %s674_s0, %s674_s0 }
  0x31   :  { %p681_p9 = por %p680_p8, %p679_p7 }
  0x33   :  { %p682_p10 = pnand %p681_p9, %p675_p6 }
  0x35   :  { %685 = shalt.err (!%p682_p10)
}
  0x36   :  { %81 = dma.hbm_to_vmem [thread:$0]  %s860_s7, 1024, %s76_s28, [#allocation9], %s715_s12, %s715_s12, %s716_s13  }
  0x37   :  { %706 = dma.done.wait [#allocation3], 128  }
  0x38   :  { %707 = vsyncadd [#allocation3], 4294967168 }
  0x39   :  { %708 = dma.done.wait [#allocation6], 1280  }
  0x3a   :  { %709 = vsyncadd [#allocation6], 4294966016 }
  0x3b   :  { %710 = dma.done.wait [#allocation9], 2048  }
  0x3c   :  { %711 = vsyncadd [#allocation9], 4294965248  ;;  %v721_v0 = vmov 0.0   ;;  %vm722_vm0 = vmmov 0   ;;  %vm113_vm1 = vcmask 1040384   ;;  %v100_v2 = vld [vmem:[#allocation5] sm:$0xff] }
  0x3d   :  { %512 = vmatprep.subr.mxu0 %v721_v0  ;;  %516 = vmatprep.mubr.msk.f32.mxu0 %vm722_vm0, %v721_v0  ;;  %v101_v1 = vld [vmem:[#allocation5 + $0x8] sm:$0x1]  ;;  %v99_v3 = vld [vmem:[#allocation2] sm:$0xff]  ;;  %vm109_vm2 = vcmask 72704   ;;  %v194_v5 = vld [vmem:[#allocation7 + $0x30] sm:$0xff]  ;;  %vm203_vm3 = vcmask 523264  }
  0x3e   :  { %519 = vmatprep.subr.mxu1 %v721_v0  ;;  %535 = vmatprep.mubr.msk.f32.mxu1 %vm722_vm0, %v721_v0  ;;  %v195_v4 = vld [vmem:[#allocation7 + $0x38] sm:$0xff]  ;;  %v193_v6 = vld [vmem:[#allocation7 + $0x28] sm:$0xff]  ;;  %v192_v7 = vld [vmem:[#allocation7 + $0x20] sm:$0xff]  ;;  %s723_s16 = smov [#allocation11]  }
  0x3f   :  { %513 = vmatpush3.msk.msra.mxu0 %vm113_vm1, %v101_v1  ;;  %520 = vmatpush3.msra.mxu1 %v195_v4  ;;  %v191_v8 = vld [vmem:[#allocation7 + $0x18] sm:$0xff]  ;;  %v190_v9 = vld [vmem:[#allocation7 + $0x10] sm:$0xff]  ;;  %v189_v10 = vld [vmem:[#allocation7 + $0x8] sm:$0xff]  ;;  %s462_s17 = sshll.u32 %s723_s16, 4  ;;  %s463_s17 = int_to_ptr.vmem [resolvable:$true] %s462_s17 }
  0x40   :  { %514 = vmatprep.subr.mxu0 %v721_v0  ;;  %521 = vmatprep.subr.mxu1 %v721_v0  ;;  %v188_v11 = vld [vmem:[#allocation7] sm:$0xff]  ;;  %v285_v12 = vld [vmem:[#allocation8 + $0x38] sm:$0xff]  ;;  %v284_v13 = vld [vmem:[#allocation8 + $0x30] sm:$0xff]  ;;  %s686_s18 = scalar_lea.vmem %s463_s17, 128  ;;  %p691_p12 = scmp.lt.s32.totalorder %s463_s17, %s463_s17 }
  0x41   :  { %515 = vmatpush3.msra.mxu0 %v100_v2  ;;  %522 = vmatpush3.msra.mxu1 %v194_v5  ;;  %v283_v14 = vld [vmem:[#allocation8 + $0x28] sm:$0xff]  ;;  %v282_v15 = vld [vmem:[#allocation8 + $0x20] sm:$0xff]  ;;  %v281_v16 = vld [vmem:[#allocation8 + $0x18] sm:$0xff]  ;;  %p687_p11 = scmp.ne.s32.totalorder %s463_s17, %s686_s18  ;;  %p692_p13 = scmp.lt.s32.totalorder %s686_s18, %s686_s18 }
  0x42   :  { %517 = vmatmul.mubr.msk.f32.vlgmr.msra.gmra.mxu0 %vm109_vm2, %v99_v3  ;;  %523 = vmatprep.subr.mxu1 %v721_v0  ;;  %v473_v17 = vld [vmem:[%s855_s2] ss:$0 sm:$0xff]  ;;  %v280_v22 = vld [vmem:[#allocation8 + $0x10] sm:$0xff]  ;;  %v278_v24 = vld [vmem:[#allocation8] sm:$0xff] }
  0x43   :  { %538 = vmatprep.subr.mxu0 %v721_v0  ;;  %524 = vmatpush3.msra.mxu1 %v193_v6  ;;  %v279_v23 = vld [vmem:[#allocation8 + $0x8] sm:$0xff]  ;;  %v374_v25 = vld [vmem:[#allocation10 + $0x38] sm:$0xff]  ;;  %v373_v26 = vld [vmem:[#allocation10 + $0x30] sm:$0xff]  ;;  %p693_p0 = por %p692_p13, %p691_p12 }
  0x44   :  { %554 = vmatprep.mubr.msk.f32.mxu0 %vm722_vm0, %v721_v0  ;;  %525 = vmatprep.subr.mxu1 %v721_v0  ;;  %v372_v27 = vld [vmem:[#allocation10 + $0x28] sm:$0xff]  ;;  %v371_v28 = vld [vmem:[#allocation10 + $0x20] sm:$0xff]  ;;  %v370_v29 = vld [vmem:[#allocation10 + $0x18] sm:$0xff] }
  0x45   :  { %526 = vmatpush3.msra.mxu1 %v192_v7  ;;  %539 = vmatpush3.msra.mxu0 %v285_v12  ;;  %v476_v30 = vld [vmem:[%s857_s4] ss:$0 sm:$0xff]  ;;  %v369_v35 = vld [vmem:[#allocation10 + $0x10] sm:$0xff]  ;;  %v367_v37 = vld [vmem:[#allocation10] sm:$0xff]  ;;  %p694_p1 = pnand %p693_p0, %p687_p11 }
  0x46   :  { %527 = vmatprep.subr.mxu1 %v721_v0  ;;  %540 = vmatprep.subr.mxu0 %v721_v0  ;;  %v368_v36 = vld [vmem:[#allocation10 + $0x8] sm:$0xff] }
  0x47   :  { %528 = vmatpush3.msra.mxu1 %v191_v8  ;;  %541 = vmatpush3.msra.mxu0 %v284_v13  ;;  %v478_v38 = vld [vmem:[%s859_s6] ss:$0 sm:$0xff] }
  0x48   :  { %529 = vmatprep.subr.mxu1 %v721_v0  ;;  %542 = vmatprep.subr.mxu0 %v721_v0  ;;  %v480_v43 = vld [vmem:[%s861_s8] ss:$0 sm:$0xff] }
  0x49   :  { %530 = vmatpush3.msra.mxu1 %v190_v9  ;;  %543 = vmatpush3.msra.mxu0 %v283_v14 }
  0x4a   :  { %531 = vmatprep.subr.mxu1 %v721_v0  ;;  %544 = vmatprep.subr.mxu0 %v721_v0 }
  0x4b   :  { %532 = vmatpush3.msra.mxu1 %v189_v10  ;;  %545 = vmatpush3.msra.mxu0 %v282_v15 }
  0x4c   :  { %533 = vmatprep.subr.mxu1 %v721_v0  ;;  %546 = vmatprep.subr.mxu0 %v721_v0 }
  0x4d   :  { %534 = vmatpush3.msra.mxu1 %v188_v11  ;;  %547 = vmatpush3.msra.mxu0 %v281_v16 }
  0x4e   :  { %557 = vmatprep.subr.mxu1 %v721_v0  ;;  %548 = vmatprep.subr.mxu0 %v721_v0 }
  0x4f   :  { %549 = vmatpush3.msra.mxu0 %v280_v22 }
  0x50   :  { %550 = vmatprep.subr.mxu0 %v721_v0 }
  0x51   :  { %551 = vmatpush3.msra.mxu0 %v279_v23 }
  0x52   :  { %552 = vmatprep.subr.mxu0 %v721_v0 }
  0x53   :  { %553 = vmatpush3.msra.mxu0 %v278_v24 }
 0x102   :  { %v183_v18 = vpop.f32.mrf.mxu0 }
 0x103   :  { %v184_v19 = vadd.f32 %v473_v17, %v183_v18 }
 0x104   :  { %v518_v20 = vpop.f32.mrf.mxu0 }
 0x105   :  { %v187_v21 = vmax.f32 %v184_v19, 0.0 }
 0x107   :  { %536 = vmatmul.mubr.msk.f32.vlgmr.msra.gmra.mxu1 %vm203_vm3, %v187_v21 }
 0x108   :  { %573 = vmatprep.mubr.msk.f32.mxu1 %vm722_vm0, %v721_v0  ;;  %558 = vmatpush3.msra.mxu1 %v374_v25 }
 0x109   :  { %559 = vmatprep.subr.mxu1 %v721_v0 }
 0x10a   :  { %560 = vmatpush3.msra.mxu1 %v373_v26 }
 0x10b   :  { %561 = vmatprep.subr.mxu1 %v721_v0 }
 0x10c   :  { %562 = vmatpush3.msra.mxu1 %v372_v27 }
 0x10d   :  { %563 = vmatprep.subr.mxu1 %v721_v0 }
 0x10e   :  { %564 = vmatpush3.msra.mxu1 %v371_v28 }
 0x10f   :  { %565 = vmatprep.subr.mxu1 %v721_v0 }
 0x110   :  { %566 = vmatpush3.msra.mxu1 %v370_v29 }
 0x111   :  { %567 = vmatprep.subr.mxu1 %v721_v0 }
 0x112   :  { %568 = vmatpush3.msra.mxu1 %v369_v35 }
 0x113   :  { %569 = vmatprep.subr.mxu1 %v721_v0 }
 0x114   :  { %570 = vmatpush3.msra.mxu1 %v368_v36 }
 0x115   :  { %571 = vmatprep.subr.mxu1 %v721_v0 }
 0x116   :  { %572 = vmatpush3.msra.mxu1 %v367_v37 }
 0x1c7   :  { %v273_v31 = vpop.f32.mrf.mxu1 }
 0x1c8   :  { %v274_v32 = vadd.f32 %v476_v30, %v273_v31 }
 0x1c9   :  { %v537_v33 = vpop.f32.mrf.mxu1 }
 0x1ca   :  { %v277_v34 = vmax.f32 %v274_v32, 0.0 }
 0x1cc   :  { %555 = vmatmul.mubr.msk.f32.vlgmr.msra.gmra.mxu0 %vm203_vm3, %v277_v34 }
 0x28c   :  { %v362_v39 = vpop.f32.mrf.mxu0 }
 0x28d   :  { %v363_v40 = vadd.f32 %v478_v38, %v362_v39 }
 0x28e   :  { %v556_v41 = vpop.f32.mrf.mxu0 }
 0x28f   :  { %v366_v42 = vmax.f32 %v363_v40, 0.0 }
 0x291   :  { %574 = vmatmul.mubr.msk.f32.vlgmr.msra.gmra.mxu1 %vm203_vm3, %v366_v42 }
 0x351   :  { %v451_v44 = vpop.f32.mrf.mxu1 }
 0x352   :  { %v452_v45 = vadd.f32 %v480_v43, %v451_v44 }
 0x353   :  { %v575_v46 = vpop.f32.mrf.mxu1 }
 0x354   :  { %455 = vst [vmem:[#allocation11] sm:$0xff] %v452_v45 }
 0x355   :  { %697 = shalt.err (!%p694_p1)
}
 0x356   :  { %465 = dma.vmem_to_hbm [thread:$0]  %s463_s17, 128, %s862_s9, [#allocation4]  }
 0x357   :  { %712 = dma.done.wait [#allocation4], 128  }
 0x358   :  { %713 = vsyncadd [#allocation4], 4294967168 }
 0x359   :  { %469 = vsyncpa [#allocation3], 1 }
 0x35a   :  { %470 = vsyncpa [#allocation6], 1 }
 0x35b   :  { %471 = vsyncpa [#allocation9], 1 }
 0x35c   :  { %472 = vsyncpa [#allocation4], 1 }

</bundles_post_ra>
